<compile_context>
chip_gen: v6e
topology: v6e:2x2x1
jax: 0.10.0
libtpu: 0.0.40
codegen_flags: <defaults>
</compile_context>

<pallas_src>
import functools

import jax
import jax.numpy as jnp
from jax.experimental import pallas as pl
from jax.experimental.pallas import tpu as pltpu


def _linear_attention_kernel(*refs, n_heads, head_dim, bt, L, S,
                             use_block_diag, matmul_dtype):
    if use_block_diag:
        (q_ref, k_ref, v_ref, mask_ref,
         wq_ref, bq_ref, wk_ref, bk_ref, wv_ref, bv_ref, wo_ref, bo_ref,
         hbd_ref, o_ref) = refs
        x_scr = None
    else:
        (q_ref, k_ref, v_ref, mask_ref,
         wq_ref, bq_ref, wk_ref, bk_ref, wv_ref, bv_ref, wo_ref, bo_ref,
         o_ref, x_scr) = refs
        hbd_ref = None

    F = n_heads * head_dim
    f32 = jnp.float32

    def cast(x):  # only MXU operands get cast; accumulation stays f32
        return x if matmul_dtype is None else x.astype(matmul_dtype)

    def mm(a, b, *, keep_f32=False):
        if not keep_f32:
            a, b = cast(a), cast(b)
        return jnp.dot(a, b, preferred_element_type=f32)

    def bmm(eq, a, b, *, keep_f32=False):   # batch-dim contraction on the MXU
        if not keep_f32:
            a, b = cast(a), cast(b)
        return jnp.einsum(eq, a, b, preferred_element_type=f32)

    def sigmoid(x):
        # torch.sigmoid; tanh form = one EUP push/element instead of exp + recip.
        return 0.5 * jnp.tanh(0.5 * x) + 0.5

    # --- Q/K/V projections: one fat (rows, C) x (C, F) matmul each. -------------
    q2 = q_ref[...].reshape(bt * L, -1)            # (bt*L, C)
    k2 = k_ref[...].reshape(bt * S, -1)            # (bt*S, C)
    v2 = v_ref[...].reshape(bt * S, -1)            # (bt*S, C)
    m2 = mask_ref[...].reshape(bt * L, 1)          # (bt*L, 1)

    qp = sigmoid(mm(q2, wq_ref[...]) + bq_ref[...])     # (bt*L, F) f32
    kp = sigmoid(mm(k2, wk_ref[...]) + bk_ref[...])     # (bt*S, F) f32
    vp = mm(v2, wv_ref[...]) + bv_ref[...]              # (bt*S, F) f32

    qp3 = qp.reshape(bt, L, F)                     # leading-dim splits: layout free
    kp3 = kp.reshape(bt, S, F)
    vp3 = vp.reshape(bt, S, F)

    ksum = jnp.sum(kp3, axis=1, keepdims=True) + 1e-6    # (bt, 1, F) f32

    if use_block_diag:
        # Block-diagonal (F, F) head mask (precomputed in the wrapper): the head
        # split is a column split, so masking the batched K^T V reproduces the
        # per-head einsums with full-width matmuls.  Free while F <= one MXU pass.
        hbd = hbd_ref[...]                                         # (F, F)
        kv = bmm('bsf,bse->bfe', kp3, vp3) * hbd                   # (bt, F, F)
        x_pre = bmm('blf,bfe->ble', qp3, kv)                       # (bt, L, F)
        # Per-head normalizer replicated across that head's columns via the same
        # block-diagonal matmul.  Kept in f32 (never cast) so the reciprocal does
        # not amplify low-precision rounding.
        qk = (qp3 * ksum).reshape(bt * L, F)                       # (bt*L, F) f32
        denom = mm(qk, hbd, keep_f32=True)                         # (bt*L, F) f32
        r = pl.reciprocal(denom, approx=True)
        z = r * (2.0 - denom * r)                                  # one Newton step
        x = x_pre.reshape(bt * L, F) * z                           # (bt*L, F)
    else:
        # Per-head (head-batched) contractions: avoids the n_heads x MXU waste of
        # the block-diagonal trick once F exceeds one MXU pass.  Per-head results
        # are written into VMEM scratch via static lane slices (no concatenate,
        # bounded live ranges); the normalizer is a VPU reduction, f32 throughout.
        for h in range(n_heads):
            sl = slice(h * head_dim, (h + 1) * head_dim)
            qh, kh, vh = qp3[:, :, sl], kp3[:, :, sl], vp3[:, :, sl]
            kv_h = bmm('bsd,bse->bde', kh, vh)                     # (bt, D, D)
            num_h = bmm('bld,bde->ble', qh, kv_h)                  # (bt, L, D)
            den_h = jnp.sum(qh * ksum[:, :, sl], axis=-1, keepdims=True)  # (bt,L,1)
            r = pl.reciprocal(den_h, approx=True)
            z = r * (2.0 - den_h * r)
            x_scr[:, :, sl] = num_h * z
        x = x_scr[...].reshape(bt * L, F)

    # --- Output projection + sequence mask (exact O columns, no padding). -------
    out = (mm(x, wo_ref[...]) + bo_ref[...]) * m2                  # (bt*L, O)
    o_ref[...] = out.reshape(bt, L, -1).astype(o_ref.dtype)


def linear_attention(queries, keys, values, mask, params, n_heads,
                     *, batch_block=None, matmul_dtype=None,
                     mxu_pass_lanes=256, vmem_limit_bytes=None,
                     vmem_budget_bytes=None):
    """Pallas forward of Linear_Attention.

    mask: (B, 1, L) as in the PyTorch module.  Weights are (in, out)-transposed.

    batch_block: batch elements fused per grid step.  Default: auto-sized to the
      largest divisor of B whose estimated VMEM footprint fits `vmem_budget_bytes`
      (conservative default fits v5e's 16 MiB default scoped limit).
      Generation guidance:
        * v7x (64 MiB VMEM, 2 TensorCores): use batch_block <= B // 4 so each core
          gets >= 2 grid steps to pipeline against; roughly halve v6e sizing.
        * v6e: whole-batch fuse is usually fine for this kernel's shapes.
        * v5e: if fusing the whole batch, also raise vmem_limit_bytes (64-96 MiB)
          so the 16 MiB default scoped limit does not force spills.
    matmul_dtype: e.g. jnp.bfloat16 to run MXU matmuls at bf16 rate for large
      shapes; the denominator path and all elementwise math stay f32.
    mxu_pass_lanes: one MXU pass width (256 on v6e/v7x, 128 on v5e).  While
      F <= this, the block-diagonal head trick is free; above it the kernel
      switches to head-batched contractions.
    vmem_limit_bytes: forwarded to pltpu.CompilerParams when given.
    """
    wq, bq, wk, bk, wv, bv, wo, bo = params
    B, L, C = queries.shape
    _, S, _ = keys.shape
    F = wq.shape[1]
    O = wo.shape[1]
    assert F % n_heads == 0, "n_features must be divisible by n_heads"
    head_dim = F // n_heads
    # Sublane alignment: the in-kernel (bt, L, C) -> (bt*L, C) merges are only
    # layout-free when L and S are multiples of 8.  Pad upstream if not.
    assert L % 8 == 0 and S % 8 == 0, "L and S must be multiples of 8 (sublane)"
    assert mask.shape == (B, 1, L), "mask must be (B, 1, L)"

    use_block_diag = F <= mxu_pass_lanes

    # --- batch_block sizing against a VMEM budget (items 3/4/6 of the review). --
    if vmem_budget_bytes is None:
        vmem_budget_bytes = (vmem_limit_bytes or 16 * 1024 * 1024) * 3 // 4

    def est_bytes(bt):
        per = (2 * (L * C + 2 * S * C + L)     # double-buffered input blocks
               + 2 * L * O                     # double-buffered output block
               + 6 * L * F + 2 * S * F         # live f32 intermediates (approx)
               + 2 * F * F)                    # KV / scratch
        fixed = 3 * (C * F + F) + F * O + O + F * F
        return 4 * (bt * per + fixed)

    if batch_block is None:
        bt = 1
        for d in range(1, B + 1):
            if B % d == 0 and est_bytes(d) <= vmem_budget_bytes:
                bt = d
    else:
        bt = batch_block
        assert B % bt == 0, "batch_block must divide the batch size"
    grid = (B // bt,)

    # Mask as (B, L, 1): matches mask[:, 0, :, None] with no in-kernel transpose.
    mask_l1 = mask[:, 0, :, None].astype(queries.dtype)

    batch_map = lambda i: (i, 0, 0)

    def const_spec(shape):
        """Grid-invariant block (weights / bias / head mask): single-buffered."""
        idx = lambda i, _n=len(shape): (0,) * _n
        try:
            return pl.BlockSpec(shape, idx, pipeline_mode=pl.Buffered(1))
        except (TypeError, AttributeError):   # fall back to default buffering
            return pl.BlockSpec(shape, idx)

    in_specs = [
        pl.BlockSpec((bt, L, C), batch_map),   # queries
        pl.BlockSpec((bt, S, C), batch_map),   # keys
        pl.BlockSpec((bt, S, C), batch_map),   # values
        pl.BlockSpec((bt, L, 1), batch_map),   # mask (B, L, 1)
        const_spec((C, F)), const_spec((1, F)),   # Wq, bq
        const_spec((C, F)), const_spec((1, F)),   # Wk, bk
        const_spec((C, F)), const_spec((1, F)),   # Wv, bv
        const_spec((F, O)), const_spec((1, O)),   # Wo, bo  (exact O, no pad)
    ]
    inputs = [queries, keys, values, mask_l1, wq, bq, wk, bk, wv, bv, wo, bo]

    scratch_shapes = []
    if use_block_diag:
        # Precompute the block-diagonal head mask once in the wrapper (resident).
        hid = jnp.arange(F, dtype=jnp.int32) // head_dim
        head_bd = (hid[:, None] == hid[None, :]).astype(jnp.float32)   # (F, F)
        in_specs.append(const_spec((F, F)))
        inputs.append(head_bd)
    else:
        scratch_shapes.append(pltpu.VMEM((bt, L, F), jnp.float32))

    out_specs = pl.BlockSpec((bt, L, O), batch_map)
    out_shape = jax.ShapeDtypeStruct((B, L, O), queries.dtype)

    kernel = functools.partial(_linear_attention_kernel,
                               n_heads=n_heads, head_dim=head_dim,
                               bt=bt, L=L, S=S,
                               use_block_diag=use_block_diag,
                               matmul_dtype=matmul_dtype)

    # Advisory cost estimate so XLA can schedule around this short custom call.
    kv_w = F if use_block_diag else head_dim
    flops = (2 * B * C * F * (L + 2 * S)                   # q/k/v projections
             + 2 * B * S * F * kv_w                        # K^T V
             + 2 * B * L * F * kv_w                        # apply
             + (2 * B * L * F * F if use_block_diag else 2 * B * L * F)  # normalizer
             + 2 * B * L * F * O)                          # out projection
    transcendentals = B * F * (L + S) + B * L * (F if use_block_diag else n_heads)
    bytes_accessed = 4 * (B * L * C + 2 * B * S * C + B * L
                          + 3 * (C * F + F) + F * O + O
                          + (F * F if use_block_diag else 0)
                          + B * L * O)

    cparams = dict(dimension_semantics=("parallel",))
    if vmem_limit_bytes is not None:
        cparams["vmem_limit_bytes"] = int(vmem_limit_bytes)

    out = pl.pallas_call(
        kernel,
        out_shape=out_shape,
        grid=grid,
        in_specs=in_specs,
        out_specs=out_specs,
        scratch_shapes=scratch_shapes,
        compiler_params=pltpu.CompilerParams(**cparams),
        cost_estimate=pl.CostEstimate(flops=flops,
                                      transcendentals=transcendentals,
                                      bytes_accessed=bytes_accessed),
    )(*inputs)
    return out


def reference(queries, keys, values, mask, params, n_heads):
    """Pure-JAX reference mirroring the PyTorch forward."""
    wq, bq, wk, bk, wv, bv, wo, bo = params
    B, L, _ = queries.shape
    _, S, _ = keys.shape
    F = wq.shape[1]
    d = F // n_heads
    qp = jax.nn.sigmoid(queries @ wq + bq)
    kp = jax.nn.sigmoid(keys @ wk + bk)
    vp = values @ wv + bv
    qh = qp.reshape(B, L, n_heads, d).transpose(0, 2, 1, 3)
    kh = kp.reshape(B, S, n_heads, d).transpose(0, 2, 1, 3)
    vh = vp.reshape(B, S, n_heads, d).transpose(0, 2, 1, 3)
    KV = jnp.einsum('bhsd,bhse->bhde', kh, vh)
    Z = 1.0 / jnp.einsum('bhld,bhd->bhl', qh, kh.sum(axis=2) + 1e-6)
    x = jnp.einsum('bhde,bhld,bhl->bhle', KV, qh, Z)
    x = x.transpose(0, 2, 1, 3).reshape(B, L, F)
    x = x @ wo + bo
    return x * mask[:, 0, :, None]


if __name__ == "__main__":
    B, L, S = 2, 16, 16
    in_channel, n_features, out_channel, n_heads = 8, 32, 8, 4

    key = jax.random.PRNGKey(0)
    ks = jax.random.split(key, 12)

    queries = jax.random.normal(ks[0], (B, L, in_channel), jnp.float32)
    keys_in = jax.random.normal(ks[1], (B, S, in_channel), jnp.float32)
    values = jax.random.normal(ks[2], (B, S, in_channel), jnp.float32)
    mask = (jax.random.uniform(ks[3], (B, 1, L)) > 0.3).astype(jnp.float32)

    def init_linear(k, fan_in, fan_out):
        kw, kb = jax.random.split(k)
        bound = 1.0 / float(fan_in) ** 0.5
        w = jax.random.uniform(kw, (fan_in, fan_out), jnp.float32, -bound, bound)
        b = jax.random.uniform(kb, (1, fan_out), jnp.float32, -bound, bound)
        return w, b

    wq, bq = init_linear(ks[4], in_channel, n_features)
    wk, bk = init_linear(ks[5], in_channel, n_features)
    wv, bv = init_linear(ks[6], in_channel, n_features)
    wo, bo = init_linear(ks[7], n_features, out_channel)
    params = (wq, bq, wk, bk, wv, bv, wo, bo)

    out = linear_attention(queries, keys_in, values, mask, params, n_heads)
    out = jax.block_until_ready(out)

    ref = reference(queries, keys_in, values, mask, params, n_heads)
    assert out.shape == (B, L, out_channel)
    # approx reciprocal + one Newton step and the tanh-form sigmoid are ~f32 exact;
    # remaining differences are f32 MXU accumulation order.
    assert jnp.allclose(out, ref, atol=2e-4, rtol=2e-4), "mismatch vs reference"

    print("KERNEL_OK")
</pallas_src>

<mosaic_0001>
module attributes {stable_mosaic.version = 11 : i64} {
  func.func @_linear_attention_kernel(%arg0: i32, %arg1: memref<2x16x8xf32, #tpu.memory_space<vmem>>, %arg2: memref<2x16x8xf32, #tpu.memory_space<vmem>>, %arg3: memref<2x16x8xf32, #tpu.memory_space<vmem>>, %arg4: memref<2x16x1xf32, #tpu.memory_space<vmem>>, %arg5: memref<8x32xf32, #tpu.memory_space<vmem>>, %arg6: memref<1x32xf32, #tpu.memory_space<vmem>>, %arg7: memref<8x32xf32, #tpu.memory_space<vmem>>, %arg8: memref<1x32xf32, #tpu.memory_space<vmem>>, %arg9: memref<8x32xf32, #tpu.memory_space<vmem>>, %arg10: memref<1x32xf32, #tpu.memory_space<vmem>>, %arg11: memref<32x8xf32, #tpu.memory_space<vmem>>, %arg12: memref<1x8xf32, #tpu.memory_space<vmem>>, %arg13: memref<32x32xf32, #tpu.memory_space<vmem>>, %arg14: memref<2x16x8xf32, #tpu.memory_space<vmem>>) attributes {dimension_semantics = [#tpu.dimension_semantics<parallel>], iteration_bounds = array<i64: 1>, scalar_prefetch = 0 : i64, scratch_operands = 0 : i64, tpu.core_type = #tpu.core_type<tc>, window_params = [{transform_indices = @transform_0, window_bounds = array<i64: 2, 16, 8>}, {transform_indices = @transform_1, window_bounds = array<i64: 2, 16, 8>}, {transform_indices = @transform_2, window_bounds = array<i64: 2, 16, 8>}, {transform_indices = @transform_3, window_bounds = array<i64: 2, 16, 1>}, {pipeline_mode = #tpu.pipeline_mode<synchronous>, transform_indices = @transform_4, window_bounds = array<i64: 8, 32>}, {pipeline_mode = #tpu.pipeline_mode<synchronous>, transform_indices = @transform_5, window_bounds = array<i64: 1, 32>}, {pipeline_mode = #tpu.pipeline_mode<synchronous>, transform_indices = @transform_6, window_bounds = array<i64: 8, 32>}, {pipeline_mode = #tpu.pipeline_mode<synchronous>, transform_indices = @transform_7, window_bounds = array<i64: 1, 32>}, {pipeline_mode = #tpu.pipeline_mode<synchronous>, transform_indices = @transform_8, window_bounds = array<i64: 8, 32>}, {pipeline_mode = #tpu.pipeline_mode<synchronous>, transform_indices = @transform_9, window_bounds = array<i64: 1, 32>}, {pipeline_mode = #tpu.pipeline_mode<synchronous>, transform_indices = @transform_10, window_bounds = array<i64: 32, 8>}, {pipeline_mode = #tpu.pipeline_mode<synchronous>, transform_indices = @transform_11, window_bounds = array<i64: 1, 8>}, {pipeline_mode = #tpu.pipeline_mode<synchronous>, transform_indices = @transform_12, window_bounds = array<i64: 32, 32>}, {transform_indices = @transform_13, window_bounds = array<i64: 2, 16, 8>}]} {
    %c0 = arith.constant 0 : index
    %c0_0 = arith.constant 0 : index
    %c0_1 = arith.constant 0 : index
    %0 = vector.load %arg1[%c0, %c0_0, %c0_1] : memref<2x16x8xf32, #tpu.memory_space<vmem>>, vector<2x16x8xf32>
    %1 = vector.shape_cast %0 : vector<2x16x8xf32> to vector<32x8xf32>
    %c0_2 = arith.constant 0 : index
    %c0_3 = arith.constant 0 : index
    %c0_4 = arith.constant 0 : index
    %2 = vector.load %arg2[%c0_2, %c0_3, %c0_4] : memref<2x16x8xf32, #tpu.memory_space<vmem>>, vector<2x16x8xf32>
    %3 = vector.shape_cast %2 : vector<2x16x8xf32> to vector<32x8xf32>
    %c0_5 = arith.constant 0 : index
    %c0_6 = arith.constant 0 : index
    %c0_7 = arith.constant 0 : index
    %4 = vector.load %arg3[%c0_5, %c0_6, %c0_7] : memref<2x16x8xf32, #tpu.memory_space<vmem>>, vector<2x16x8xf32>
    %5 = vector.shape_cast %4 : vector<2x16x8xf32> to vector<32x8xf32>
    %c0_8 = arith.constant 0 : index
    %c0_9 = arith.constant 0 : index
    %c0_10 = arith.constant 0 : index
    %6 = vector.load %arg4[%c0_8, %c0_9, %c0_10] : memref<2x16x1xf32, #tpu.memory_space<vmem>>, vector<2x16x1xf32>
    %7 = vector.shape_cast %6 : vector<2x16x1xf32> to vector<32x1xf32>
    %c0_11 = arith.constant 0 : index
    %c0_12 = arith.constant 0 : index
    %8 = vector.load %arg5[%c0_11, %c0_12] : memref<8x32xf32, #tpu.memory_space<vmem>>, vector<8x32xf32>
    %cst = arith.constant dense<0.000000e+00> : vector<32x32xf32>
    %9 = tpu.matmul %1, %8, %cst {dimension_numbers = #tpu.dot_dimension_numbers<[1], [0], [0], [1], [0, 0, 1, 1], [], []>} : vector<32x8xf32>, vector<8x32xf32>, vector<32x32xf32> -> vector<32x32xf32>
    %c0_13 = arith.constant 0 : index
    %c0_14 = arith.constant 0 : index
    %10 = vector.load %arg6[%c0_13, %c0_14] : memref<1x32xf32, #tpu.memory_space<vmem>>, vector<1x32xf32>
    %11 = vector.broadcast %10 : vector<1x32xf32> to vector<32x32xf32>
    %12 = arith.addf %9, %11 : vector<32x32xf32>
    %cst_15 = arith.constant 5.000000e-01 : f32
    %13 = vector.broadcast %cst_15 : f32 to vector<32x32xf32>
    %14 = arith.mulf %13, %12 : vector<32x32xf32>
    %15 = math.tanh %14 : vector<32x32xf32>
    %cst_16 = arith.constant 5.000000e-01 : f32
    %16 = vector.broadcast %cst_16 : f32 to vector<32x32xf32>
    %17 = arith.mulf %16, %15 : vector<32x32xf32>
    %cst_17 = arith.constant 5.000000e-01 : f32
    %18 = vector.broadcast %cst_17 : f32 to vector<32x32xf32>
    %19 = arith.addf %17, %18 : vector<32x32xf32>
    %c0_18 = arith.constant 0 : index
    %c0_19 = arith.constant 0 : index
    %20 = vector.load %arg7[%c0_18, %c0_19] : memref<8x32xf32, #tpu.memory_space<vmem>>, vector<8x32xf32>
    %cst_20 = arith.constant dense<0.000000e+00> : vector<32x32xf32>
    %21 = tpu.matmul %3, %20, %cst_20 {dimension_numbers = #tpu.dot_dimension_numbers<[1], [0], [0], [1], [0, 0, 1, 1], [], []>} : vector<32x8xf32>, vector<8x32xf32>, vector<32x32xf32> -> vector<32x32xf32>
    %c0_21 = arith.constant 0 : index
    %c0_22 = arith.constant 0 : index
    %22 = vector.load %arg8[%c0_21, %c0_22] : memref<1x32xf32, #tpu.memory_space<vmem>>, vector<1x32xf32>
    %23 = vector.broadcast %22 : vector<1x32xf32> to vector<32x32xf32>
    %24 = arith.addf %21, %23 : vector<32x32xf32>
    %cst_23 = arith.constant 5.000000e-01 : f32
    %25 = vector.broadcast %cst_23 : f32 to vector<32x32xf32>
    %26 = arith.mulf %25, %24 : vector<32x32xf32>
    %27 = math.tanh %26 : vector<32x32xf32>
    %cst_24 = arith.constant 5.000000e-01 : f32
    %28 = vector.broadcast %cst_24 : f32 to vector<32x32xf32>
    %29 = arith.mulf %28, %27 : vector<32x32xf32>
    %cst_25 = arith.constant 5.000000e-01 : f32
    %30 = vector.broadcast %cst_25 : f32 to vector<32x32xf32>
    %31 = arith.addf %29, %30 : vector<32x32xf32>
    %c0_26 = arith.constant 0 : index
    %c0_27 = arith.constant 0 : index
    %32 = vector.load %arg9[%c0_26, %c0_27] : memref<8x32xf32, #tpu.memory_space<vmem>>, vector<8x32xf32>
    %cst_28 = arith.constant dense<0.000000e+00> : vector<32x32xf32>
    %33 = tpu.matmul %5, %32, %cst_28 {dimension_numbers = #tpu.dot_dimension_numbers<[1], [0], [0], [1], [0, 0, 1, 1], [], []>} : vector<32x8xf32>, vector<8x32xf32>, vector<32x32xf32> -> vector<32x32xf32>
    %c0_29 = arith.constant 0 : index
    %c0_30 = arith.constant 0 : index
    %34 = vector.load %arg10[%c0_29, %c0_30] : memref<1x32xf32, #tpu.memory_space<vmem>>, vector<1x32xf32>
    %35 = vector.broadcast %34 : vector<1x32xf32> to vector<32x32xf32>
    %36 = arith.addf %33, %35 : vector<32x32xf32>
    %37 = vector.shape_cast %19 : vector<32x32xf32> to vector<2x16x32xf32>
    %38 = vector.shape_cast %31 : vector<32x32xf32> to vector<2x16x32xf32>
    %39 = vector.shape_cast %36 : vector<32x32xf32> to vector<2x16x32xf32>
    %cst_31 = arith.constant dense<0.000000e+00> : vector<2x32xf32>
    %40 = vector.multi_reduction <add>, %38, %cst_31 [1] : vector<2x16x32xf32> to vector<2x32xf32>
    %41 = vector.shape_cast %40 : vector<2x32xf32> to vector<2x1x32xf32>
    %cst_32 = arith.constant 9.99999997E-7 : f32
    %42 = vector.broadcast %cst_32 : f32 to vector<2x1x32xf32>
    %43 = arith.addf %41, %42 : vector<2x1x32xf32>
    %c0_33 = arith.constant 0 : index
    %c0_34 = arith.constant 0 : index
    %44 = vector.load %arg13[%c0_33, %c0_34] : memref<32x32xf32, #tpu.memory_space<vmem>>, vector<32x32xf32>
    "tpu.trace_start"() <{level = 10 : i32, message = "bsf,bse->bfe"}> : () -> ()
    %cst_35 = arith.constant dense<0.000000e+00> : vector<2x32x32xf32>
    %45 = tpu.matmul %38, %39, %cst_35 {dimension_numbers = #tpu.dot_dimension_numbers<[1], [1], [2], [2], [0, 0, 0, 2, 1, 2], [0], [0]>} : vector<2x16x32xf32>, vector<2x16x32xf32>, vector<2x32x32xf32> -> vector<2x32x32xf32>
    "tpu.trace_stop"() : () -> ()
    %46 = vector.shape_cast %44 : vector<32x32xf32> to vector<1x32x32xf32>
    %47 = vector.broadcast %46 : vector<1x32x32xf32> to vector<2x32x32xf32>
    %48 = arith.mulf %45, %47 : vector<2x32x32xf32>
    "tpu.trace_start"() <{level = 10 : i32, message = "blf,bfe->ble"}> : () -> ()
    %cst_36 = arith.constant dense<0.000000e+00> : vector<2x16x32xf32>
    %49 = tpu.matmul %37, %48, %cst_36 {dimension_numbers = #tpu.dot_dimension_numbers<[2], [1], [1], [2], [0, 0, 0, 1, 1, 2], [0], [0]>} : vector<2x16x32xf32>, vector<2x32x32xf32>, vector<2x16x32xf32> -> vector<2x16x32xf32>
    "tpu.trace_stop"() : () -> ()
    %50 = vector.broadcast %43 : vector<2x1x32xf32> to vector<2x16x32xf32>
    %51 = arith.mulf %37, %50 : vector<2x16x32xf32>
    %52 = vector.shape_cast %51 : vector<2x16x32xf32> to vector<32x32xf32>
    %cst_37 = arith.constant dense<0.000000e+00> : vector<32x32xf32>
    %53 = tpu.matmul %52, %44, %cst_37 {dimension_numbers = #tpu.dot_dimension_numbers<[1], [0], [0], [1], [0, 0, 1, 1], [], []>} : vector<32x32xf32>, vector<32x32xf32>, vector<32x32xf32> -> vector<32x32xf32>
    %54 = tpu.reciprocal %53 {approx = true} : vector<32x32xf32> -> vector<32x32xf32>
    %55 = arith.mulf %53, %54 : vector<32x32xf32>
    %cst_38 = arith.constant 2.000000e+00 : f32
    %56 = vector.broadcast %cst_38 : f32 to vector<32x32xf32>
    %57 = arith.subf %56, %55 : vector<32x32xf32>
    %58 = arith.mulf %54, %57 : vector<32x32xf32>
    %59 = vector.shape_cast %49 : vector<2x16x32xf32> to vector<32x32xf32>
    %60 = arith.mulf %59, %58 : vector<32x32xf32>
    %c0_39 = arith.constant 0 : index
    %c0_40 = arith.constant 0 : index
    %61 = vector.load %arg11[%c0_39, %c0_40] : memref<32x8xf32, #tpu.memory_space<vmem>>, vector<32x8xf32>
    %cst_41 = arith.constant dense<0.000000e+00> : vector<32x8xf32>
    %62 = tpu.matmul %60, %61, %cst_41 {dimension_numbers = #tpu.dot_dimension_numbers<[1], [0], [0], [1], [0, 0, 1, 1], [], []>} : vector<32x32xf32>, vector<32x8xf32>, vector<32x8xf32> -> vector<32x8xf32>
    %c0_42 = arith.constant 0 : index
    %c0_43 = arith.constant 0 : index
    %63 = vector.load %arg12[%c0_42, %c0_43] : memref<1x8xf32, #tpu.memory_space<vmem>>, vector<1x8xf32>
    %64 = vector.broadcast %63 : vector<1x8xf32> to vector<32x8xf32>
    %65 = arith.addf %62, %64 : vector<32x8xf32>
    %66 = vector.broadcast %7 : vector<32x1xf32> to vector<32x8xf32>
    %67 = arith.mulf %65, %66 : vector<32x8xf32>
    %68 = vector.shape_cast %67 : vector<32x8xf32> to vector<2x16x8xf32>
    %c0_44 = arith.constant 0 : index
    %c0_45 = arith.constant 0 : index
    %c0_46 = arith.constant 0 : index
    %69 = vector.load %arg14[%c0_44, %c0_45, %c0_46] : memref<2x16x8xf32, #tpu.memory_space<vmem>>, vector<2x16x8xf32>
    tpu.vector_store %arg14[%c0_44, %c0_45, %c0_46], %68 {strides = array<i32>} : memref<2x16x8xf32, #tpu.memory_space<vmem>>, vector<2x16x8xf32>,
    return
  }
  func.func @transform_0(%arg0: i32) -> (i32, i32, i32) {
    %c0_i32 = arith.constant 0 : i32
    %c0_i32_0 = arith.constant 0 : i32
    %c0_i32_1 = arith.constant 0 : i32
    return %arg0, %c0_i32, %c0_i32_0 : i32, i32, i32
  }
  func.func @transform_1(%arg0: i32) -> (i32, i32, i32) {
    %c0_i32 = arith.constant 0 : i32
    %c0_i32_0 = arith.constant 0 : i32
    %c0_i32_1 = arith.constant 0 : i32
    return %arg0, %c0_i32, %c0_i32_0 : i32, i32, i32
  }
  func.func @transform_2(%arg0: i32) -> (i32, i32, i32) {
    %c0_i32 = arith.constant 0 : i32
    %c0_i32_0 = arith.constant 0 : i32
    %c0_i32_1 = arith.constant 0 : i32
    return %arg0, %c0_i32, %c0_i32_0 : i32, i32, i32
  }
  func.func @transform_3(%arg0: i32) -> (i32, i32, i32) {
    %c0_i32 = arith.constant 0 : i32
    %c0_i32_0 = arith.constant 0 : i32
    %c0_i32_1 = arith.constant 0 : i32
    return %arg0, %c0_i32, %c0_i32_0 : i32, i32, i32
  }
  func.func @transform_4(%arg0: i32) -> (i32, i32) {
    %c0_i32 = arith.constant 0 : i32
    %c0_i32_0 = arith.constant 0 : i32
    %c0_i32_1 = arith.constant 0 : i32
    return %c0_i32, %c0_i32_0 : i32, i32
  }
  func.func @transform_5(%arg0: i32) -> (i32, i32) {
    %c0_i32 = arith.constant 0 : i32
    %c0_i32_0 = arith.constant 0 : i32
    %c0_i32_1 = arith.constant 0 : i32
    return %c0_i32, %c0_i32_0 : i32, i32
  }
  func.func @transform_6(%arg0: i32) -> (i32, i32) {
    %c0_i32 = arith.constant 0 : i32
    %c0_i32_0 = arith.constant 0 : i32
    %c0_i32_1 = arith.constant 0 : i32
    return %c0_i32, %c0_i32_0 : i32, i32
  }
  func.func @transform_7(%arg0: i32) -> (i32, i32) {
    %c0_i32 = arith.constant 0 : i32
    %c0_i32_0 = arith.constant 0 : i32
    %c0_i32_1 = arith.constant 0 : i32
    return %c0_i32, %c0_i32_0 : i32, i32
  }
  func.func @transform_8(%arg0: i32) -> (i32, i32) {
    %c0_i32 = arith.constant 0 : i32
    %c0_i32_0 = arith.constant 0 : i32
    %c0_i32_1 = arith.constant 0 : i32
    return %c0_i32, %c0_i32_0 : i32, i32
  }
  func.func @transform_9(%arg0: i32) -> (i32, i32) {
    %c0_i32 = arith.constant 0 : i32
    %c0_i32_0 = arith.constant 0 : i32
    %c0_i32_1 = arith.constant 0 : i32
    return %c0_i32, %c0_i32_0 : i32, i32
  }
  func.func @transform_10(%arg0: i32) -> (i32, i32) {
    %c0_i32 = arith.constant 0 : i32
    %c0_i32_0 = arith.constant 0 : i32
    %c0_i32_1 = arith.constant 0 : i32
    return %c0_i32, %c0_i32_0 : i32, i32
  }
  func.func @transform_11(%arg0: i32) -> (i32, i32) {
    %c0_i32 = arith.constant 0 : i32
    %c0_i32_0 = arith.constant 0 : i32
    %c0_i32_1 = arith.constant 0 : i32
    return %c0_i32, %c0_i32_0 : i32, i32
  }
  func.func @transform_12(%arg0: i32) -> (i32, i32) {
    %c0_i32 = arith.constant 0 : i32
    %c0_i32_0 = arith.constant 0 : i32
    %c0_i32_1 = arith.constant 0 : i32
    return %c0_i32, %c0_i32_0 : i32, i32
  }
  func.func @transform_13(%arg0: i32) -> (i32, i32, i32) {
    %c0_i32 = arith.constant 0 : i32
    %c0_i32_0 = arith.constant 0 : i32
    %c0_i32_1 = arith.constant 0 : i32
    return %arg0, %c0_i32, %c0_i32_0 : i32, i32, i32
  }
}

</mosaic_0001>

<bundles_post_ra>
// kernel: tpu_custom_call.1
= control target key start
LH: loop header
LB: loop body
LE: loop exit
PB: predicated region body
PF: predicated region fallthrough
CT: control target
= control target key end

     0   :  { %vm68_vm0 = vcmask 64512   ;;  %vm408_vm1 = vcmask 261120   ;;  %vm465_vm2 = vcmask 130048   ;;  %s1588_s4 = inlined_call_operand.vmem [shape: f32[8,32], index: 4, kind: input, shape index: {}]   ;;  %s1589_s0 = inlined_call_operand.vmem [shape: f32[2,16,8], index: 0, kind: input, shape index: {}]   ;;  %s1590_s6 = inlined_call_operand.vmem [shape: f32[8,32], index: 6, kind: input, shape index: {}]   ;;  %s1591_s1 = inlined_call_operand.vmem [shape: f32[2,16,8], index: 1, kind: input, shape index: {}]   ;;  %s1592_s8 = inlined_call_operand.vmem [shape: f32[8,32], index: 8, kind: input, shape index: {}]   ;;  %s1593_s2 = inlined_call_operand.vmem [shape: f32[2,16,8], index: 2, kind: input, shape index: {}]   ;;  %s1594_s5 = inlined_call_operand.vmem [shape: f32[1,32], index: 5, kind: input, shape index: {}]   ;;  %s1595_s7 = inlined_call_operand.vmem [shape: f32[1,32], index: 7, kind: input, shape index: {}]   ;;  %s1596_s9 = inlined_call_operand.vmem [shape: f32[1,32], index: 9, kind: input, shape index: {}]   ;;  %s1597_s12 = inlined_call_operand.vmem [shape: f32[32,32], index: 12, kind: input, shape index: {}]   ;;  %s1598_s10 = inlined_call_operand.vmem [shape: f32[32,8], index: 10, kind: input, shape index: {}]   ;;  %s1599_s3 = inlined_call_operand.vmem [shape: f32[2,16,1], index: 3, kind: input, shape index: {}]   ;;  %s1600_s11 = inlined_call_operand.vmem [shape: f32[1,8], index: 11, kind: input, shape index: {}]   ;;  %s1601_s13 = inlined_call_operand.vmem [shape: f32[2,16,8], index: 13, kind: output, shape index: {}]  }
   0x1   :  { %v60_v0 = vld [vmem:[%s1588_s4] sm:$0xff]  ;;  %v46_v1 = vld [vmem:[%s1589_s0 + $0x10] sm:$0xff]  ;;  %v47_v2 = vld [vmem:[%s1589_s0 + $0x18] sm:$0xff] }
   0x2   :  { %1308 = vmatprep.subr.mxu1 %v60_v0  ;;  %1219 = vmatprep.mubr.msk.f32.mxu1 %vm68_vm0, %v46_v1  ;;  %v182_v3 = vld [vmem:[%s1590_s6] sm:$0xff]  ;;  %v45_v6 = vld [vmem:[%s1589_s0 + $0x8] sm:$0xff]  ;;  %v50_v9 = vld [vmem:[%s1591_s1 + $0x10] sm:$0xff] }
   0x3   :  { %v48_v4 = vld [vmem:[%s1591_s1] sm:$0xff]  ;;  %1309 = vmatpush3.msra.mxu1 %v60_v0  ;;  %1214 = vmatprep.subr.mxu0 %v60_v0  ;;  %v49_v8 = vld [vmem:[%s1591_s1 + $0x8] sm:$0xff]  ;;  %v51_v12 = vld [vmem:[%s1591_s1 + $0x18] sm:$0xff] }
   0x4   :  { %v44_v5 = vld [vmem:[%s1589_s0] sm:$0xff]  ;;  %1220 = vmatmul.mubr.msk.f32.vlgmr.msra.gmra.mxu1 %vm68_vm0, %v47_v2  ;;  %1222 = vmatprep.subr.mxu1 %v182_v3  ;;  %v53_v11 = vld [vmem:[%s1593_s2 + $0x8] sm:$0xff]  ;;  %v54_v13 = vld [vmem:[%s1593_s2 + $0x10] sm:$0xff] }
   0x5   :  { %v303_v7 = vld [vmem:[%s1592_s8] sm:$0xff]  ;;  %1223 = vmatpush3.msra.mxu1 %v182_v3  ;;  %1224 = vmatprep.mubr.msk.f32.mxu1 %vm68_vm0, %v48_v4  ;;  %v55_v14 = vld [vmem:[%s1593_s2 + $0x18] sm:$0xff] }
   0x6   :  { %1215 = vmatpush3.msra.mxu0 %v60_v0  ;;  %1216 = vmatprep.mubr.msk.f32.mxu0 %vm68_vm0, %v44_v5  ;;  %v52_v10 = vld [vmem:[%s1593_s2] sm:$0xff] }
   0x7   :  { %1217 = vmatmul.mubr.msk.f32.vlgmr.msra.gmra.mxu0 %vm68_vm0, %v45_v6  ;;  %1230 = vmatprep.subr.mxu0 %v303_v7  ;;  %v1469_v15 = vld [vmem:[%s1594_s5] ss:$0 sm:$0xff] }
   0x8   :  { %1225 = vmatmul.mubr.msk.f32.vlgmr.msra.gmra.mxu1 %vm68_vm0, %v49_v8  ;;  %1231 = vmatpush3.msra.mxu0 %v303_v7  ;;  %v1128_v19 = vld [vmem:[%s1595_s7] ss:$0 sm:$0xff] }
   0x9   :  { %1227 = vmatprep.mubr.msk.f32.mxu1 %vm68_vm0, %v50_v9  ;;  %1232 = vmatprep.mubr.msk.f32.mxu0 %vm68_vm0, %v52_v10  ;;  %v1133_v25 = vld [vmem:[%s1596_s9] ss:$0 sm:$0xff] }
   0xb   :  { %1233 = vmatmul.mubr.msk.f32.vlgmr.msra.gmra.mxu0 %vm68_vm0, %v53_v11 }
   0xc   :  { %1228 = vmatmul.mubr.msk.f32.gmra.mxu1 %vm68_vm0, %v51_v12  ;;  %1235 = vmatprep.mubr.msk.f32.mxu0 %vm68_vm0, %v54_v13 }
   0xf   :  { %1236 = vmatmul.mubr.msk.f32.gmra.mxu0 %vm68_vm0, %v55_v14 }
  0xc4   :  { %v1221_v16 = vpop.f32.mrf.mxu1 }
  0xc5   :  { %v163_v17 = vadd.f32 %v1221_v16, %v1469_v15 }
  0xc6   :  { %v1472_v18 = vpop.f32.mrf.mxu1 }
  0xc7   :  { %v1218_v20 = vpop.f32.mrf.mxu0  ;;  %v169_v44 = vmul.f32 0.5, %v163_v17 }
  0xc8   :  { %v1226_v21 = vpop.f32.mrf.mxu1  ;;  %v153_v22 = vadd.f32 %v1218_v20, %v1469_v15 }
  0xc9   :  { %v274_v23 = vadd.f32 %v1226_v21, %v1128_v19  ;;  %v1478_v24 = vpop.f32.mrf.mxu0 }
  0xca   :  { %v268_v26 = vpop.f32.mrf.mxu1  ;;  %v167_v40 = vmul.f32 0.5, %v153_v22 }
  0xcb   :  { %v288_v27 = vmul.f32 0.5, %v274_v23  ;;  %v269_v28 = vadd.f32 %v1128_v19, %v268_v26  ;;  %v1234_v29 = vpop.f32.mrf.mxu0  ;;  %v158_v26 = vadd.f32 %v1469_v15, %v1472_v18 }
  0xcc   :  { %v1229_v30 = vpop.f32.mrf.mxu1  ;;  %v395_v31 = vadd.f32 %v1234_v29, %v1133_v25 }
  0xcd   :  { %1314 = vtanh.f32 %v288_v27  ;;  %v287_v32 = vmul.f32 0.5, %v269_v28  ;;  %v284_v33 = vadd.f32 %v1229_v30, %v1128_v19  ;;  %v389_v34 = vpop.f32.mrf.mxu0  ;;  %v168_v28 = vmul.f32 0.5, %v158_v26 }
  0xce   :  { %v278_v35 = vpop.f32.mrf.mxu1  ;;  %v390_v36 = vadd.f32 %v1133_v25, %v389_v34  ;;  %1238 = vmatprep.subr.mxu1 %v395_v31 }
  0xcf   :  { %1316 = vtanh.f32 %v287_v32  ;;  %v290_v37 = vmul.f32 0.5, %v284_v33  ;;  %v279_v38 = vadd.f32 %v1128_v19, %v278_v35  ;;  %1239 = vmatpush3.msra.mxu1 %v395_v31  ;;  %v1237_v56 = vpop.f32.mrf.mxu0 }
  0xd0   :  { %1240 = vmatprep.subr.mxu1 %v390_v36  ;;  %v405_v59 = vadd.f32 %v1237_v56, %v1133_v25 }
  0xd1   :  { %1318 = vtanh.f32 %v290_v37  ;;  %v289_v39 = vmul.f32 0.5, %v279_v38  ;;  %1241 = vmatpush3.msra.mxu1 %v390_v36  ;;  %v399_v62 = vpop.f32.mrf.mxu0 }
  0xd2   :  { %v400_v1 = vadd.f32 %v1133_v25, %v399_v62  ;;  %1248 = vmatprep.subr.mxu0 %v405_v59  ;;  %v148_v25 = vadd.f32 %v1469_v15, %v1478_v24  ;;  %v986_v62 = vld [vmem:[%s1598_s10 + $0x18] sm:$0xff] }
  0xd3   :  { %1320 = vtanh.f32 %v289_v39  ;;  %1249 = vmatpush3.msra.mxu0 %v405_v59 }
  0xd4   :  { %1322 = vtanh.f32 %v167_v40  ;;  %1250 = vmatprep.subr.mxu0 %v400_v1  ;;  %v166_v27 = vmul.f32 0.5, %v148_v25 }
  0xd5   :  { %1324 = vtanh.f32 %v169_v44  ;;  %1251 = vmatpush3.msra.mxu0 %v400_v1  ;;  %v983_v1 = vld [vmem:[%s1598_s10] sm:$0xff] }
  0xd6   :  { %1326 = vtanh.f32 %v166_v27 }
  0xd7   :  { %1328 = vtanh.f32 %v168_v28 }
  0xda   :  { %v1315_v41 = vpop.eup %1314 }
  0xdb   :  { %v296_v42 = vmul.f32 0.5, %v1315_v41 }
  0xdc   :  { %v1317_v43 = vpop.eup %1316 }
  0xdd   :  { %v295_v45 = vmul.f32 0.5, %v1317_v43  ;;  %v300_v46 = vadd.f32 0.5, %v296_v42  ;;  %v432_v43 = vld [vmem:[%s1597_s12 + $0x18] sm:$0xff] }
  0xde   :  { %v1319_v47 = vpop.eup %1318 }
  0xdf   :  { %v299_v48 = vadd.f32 0.5, %v295_v45  ;;  %v298_v49 = vmul.f32 0.5, %v1319_v47  ;;  %v410_v53 = vsel %vm408_vm1, %v300_v46, 0.0  ;;  %v431_v45 = vld [vmem:[%s1597_s12 + $0x10] sm:$0xff] }
  0xe0   :  { %v1321_v50 = vpop.eup %1320 }
  0xe1   :  { %433 = vxpose.xlu0.b32.start [1/2] (short) (narrow) %v299_v48, 32  ;;  %v409_v51 = vsel %vm408_vm1, %v299_v48, 0.0  ;;  %v297_v52 = vmul.f32 0.5, %v1321_v50  ;;  %v302_v54 = vadd.f32 0.5, %v298_v49  ;;  %v1323_v2 = vpop.eup %1322  ;;  %v430_v48 = vld [vmem:[%s1597_s12 + $0x8] sm:$0xff] }
  0xe2   :  { %v411_v55 = vadd.f32 %v410_v53, %v409_v51  ;;  %v175_v5 = vmul.f32 0.5, %v1323_v2  ;;  %v1325_v10 = vpop.eup %1324  ;;  %v429_v51 = vld [vmem:[%s1597_s12] sm:$0xff]  ;;  %v1338_v2 = vmov 0  }
  0xe3   :  { %v301_v57 = vadd.f32 0.5, %v297_v52  ;;  %v419_v58 = vsel %vm408_vm1, %v302_v54, 0.0  ;;  %v177_v14 = vmul.f32 0.5, %v1325_v10  ;;  %v1327_v32 = vpop.eup %1326 }
  0xe4   :  { %v412_v60 = vrot.slane %v411_v55, 4  ;;  %v1487_v11 = vadd.f32 0.5, %v175_v5  ;;  %v174_v33 = vmul.f32 0.5, %v1327_v32  ;;  %v1329_v35 = vpop.eup %1328  ;;  %v58_v5 = vld [vmem:[%s1599_s3 + $0x10] sm:$0xff] }
  0xe5   :  { %563 = vxpose.xlu1.b32.start [1/2] (short) (narrow) %v301_v57, 32  ;;  %v418_v61 = vsel %vm408_vm1, %v301_v57, 0.0  ;;  %434 = vxpose.xlu0.b32.end [2/2] (short) (narrow) %v300_v46, 32  ;;  %v1495_v21 = vadd.f32 0.5, %v177_v14  ;;  %v176_v15 = vmul.f32 0.5, %v1329_v35 }
  0xe6   :  { %v413_v63 = vadd.f32 %v412_v60, %v411_v55  ;;  %v420_v0 = vadd.f32 %v419_v58, %v418_v61  ;;  %v178_v18 = vadd.f32 0.5, %v174_v33 }
  0xe7   :  { %v180_v38 = vadd.f32 0.5, %v176_v15 }
  0xe8   :  { %v414_v3 = vrot.slane %v413_v63, 2  ;;  %v421_v4 = vrot.slane %v420_v0, 4 }
  0xe9   :  { %564 = vxpose.xlu1.b32.end [2/2] (short) (narrow) %v302_v54, 32 }
  0xea   :  { %v415_v6 = vadd.f32 %v414_v3, %v413_v63  ;;  %v422_v7 = vadd.f32 %v421_v4, %v420_v0  ;;  %v985_v63 = vld [vmem:[%s1598_s10 + $0x10] sm:$0xff]  ;;  %v984_v0 = vld [vmem:[%s1598_s10 + $0x8] sm:$0xff]  ;;  %v56_v4 = vld [vmem:[%s1599_s3] sm:$0xff] }
  0xeb   :  { %v57_v3 = vld [vmem:[%s1599_s3 + $0x8] sm:$0xff] }
  0xec   :  { %v416_v8 = vrot.slane %v415_v6, 1  ;;  %v423_v9 = vrot.slane %v422_v7, 2 }
  0xee   :  { %v424_v12 = vadd.f32 %v423_v9, %v422_v7  ;;  %v417_v13 = vadd.f32 %v416_v8, %v415_v6  ;;  %v59_v6 = vld [vmem:[%s1599_s3 + $0x18] sm:$0xff] }
  0xf0   :  { %v425_v16 = vrot.slane %v424_v12, 1  ;;  %v1489_v17 = vadd.f32 1e-06, %v417_v13 }
  0xf2   :  { %v1493_v19 = vmul.f32 %v1489_v17, %v1487_v11  ;;  %v426_v20 = vadd.f32 %v425_v16, %v424_v12  ;;  %v862_v60 = vmul.f32 %v1489_v17, %v178_v18 }
  0xf4   :  { %v1497_v22 = vadd.f32 1e-06, %v426_v20 }
  0xf6   :  { %v1501_v23 = vmul.f32 %v1497_v22, %v1495_v21  ;;  %v864_v61 = vmul.f32 %v1497_v22, %v180_v38 }
 0x107   :  { %1313 = vset.pattern.permute.xlu1 %v1338_v2 }
 0x10e   :  { %1312 = vset.pattern.permute.xlu0 %v1338_v2 }
 0x10f   :  { %1098 = vperm.xlu1 %1313, %v57_v3  }
 0x113   :  { %1103 = vperm.xlu1 %1313, %v58_v5  }
 0x116   :  { %1093 = vperm.xlu0 %1312, %v56_v4  }
 0x117   :  { %1108 = vperm.xlu1 %1313, %v59_v6  }
 0x15d   :  { %v449_v29 = vpop.trf.xlu0 }
 0x15e   :  { %1242 = vmatprep.mubr.msk.f32.mxu1 %vm465_vm2, %v449_v29 }
 0x161   :  { %v579_v30 = vpop.trf.xlu1  ;;  %v450_v31 = vpop.trf.xlu0 }
 0x162   :  { %1243 = vmatmul.mubr.msk.f32.vlgmr.msra.gmra.mxu1 %vm465_vm2, %v450_v31  ;;  %1252 = vmatprep.mubr.msk.f32.mxu0 %vm465_vm2, %v579_v30 }
 0x165   :  { %v580_v24 = vpop.trf.xlu1  ;;  %v451_v34 = vpop.trf.xlu0 }
 0x166   :  { %1245 = vmatprep.mubr.msk.f32.mxu1 %vm465_vm2, %v451_v34  ;;  %1253 = vmatmul.mubr.msk.f32.vlgmr.msra.gmra.mxu0 %vm465_vm2, %v580_v24 }
 0x169   :  { %v581_v36 = vpop.trf.xlu1  ;;  %v452_v37 = vpop.trf.xlu0 }
 0x16a   :  { %1246 = vmatmul.mubr.msk.f32.gmra.mxu1 %vm465_vm2, %v452_v37  ;;  %1255 = vmatprep.mubr.msk.f32.mxu0 %vm465_vm2, %v581_v36  ;;  %v1154_v36 = vld [vmem:[%s1600_s11] ss:$0 sm:$0xff] }
 0x16b   :  { %1266 = vmatprep.mubr.msk.f32.mxu1 %vm408_vm1, %v178_v18 }
 0x16d   :  { %v582_v39 = vpop.trf.xlu1 }
 0x16e   :  { %1256 = vmatmul.mubr.msk.f32.gmra.mxu0 %vm465_vm2, %v582_v39 }
 0x16f   :  { %1277 = vmatprep.mubr.msk.f32.mxu0 %vm408_vm1, %v180_v38 }
 0x18a   :  { %v1099_v18 = vpop.permute.xlu1 %1098 }
 0x18e   :  { %v1104_v37 = vpop.permute.xlu1 %1103 }
 0x222   :  { %v1244_v40 = vpop.f32.mrf.mxu1 }
 0x223   :  { %v693_v53 = vmul.f32 %v1244_v40, %v430_v48 }
 0x224   :  { %v544_v42 = vpop.f32.mrf.mxu1 }
 0x225   :  { %v692_v56 = vmul.f32 %v544_v42, %v429_v51 }
 0x226   :  { %v1254_v41 = vpop.f32.mrf.mxu0 }
 0x227   :  { %v697_v57 = vmul.f32 %v1254_v41, %v430_v48  ;;  %v1094_v41 = vpop.permute.xlu0 %1093 }
 0x228   :  { %v673_v46 = vpop.f32.mrf.mxu0 }
 0x229   :  { %v696_v59 = vmul.f32 %v673_v46, %v429_v51 }
 0x22a   :  { %v1247_v44 = vpop.f32.mrf.mxu1 }
 0x22b   :  { %v695_v47 = vmul.f32 %v1247_v44, %v432_v43 }
 0x22c   :  { %v554_v49 = vpop.f32.mrf.mxu1 }
 0x22d   :  { %v694_v50 = vmul.f32 %v554_v49, %v431_v45  ;;  %1258 = vmatprep.subr.mxu1 %v695_v47 }
 0x22e   :  { %v1257_v52 = vpop.f32.mrf.mxu0  ;;  %1259 = vmatpush3.msra.mxu1 %v695_v47  ;;  %v1109_v47 = vpop.permute.xlu1 %1108 }
 0x22f   :  { %v699_v54 = vmul.f32 %v1257_v52, %v432_v43  ;;  %1260 = vmatprep.subr.mxu1 %v694_v50 }
 0x230   :  { %v683_v55 = vpop.f32.mrf.mxu0  ;;  %1261 = vmatpush3.msra.mxu1 %v694_v50 }
 0x231   :  { %v698_v58 = vmul.f32 %v683_v55, %v431_v45  ;;  %1262 = vmatprep.subr.mxu1 %v693_v53  ;;  %1269 = vmatprep.subr.mxu0 %v699_v54 }
 0x232   :  { %1263 = vmatpush3.msra.mxu1 %v693_v53  ;;  %1270 = vmatpush3.msra.mxu0 %v699_v54 }
 0x233   :  { %1264 = vmatprep.subr.mxu1 %v692_v56  ;;  %1271 = vmatprep.subr.mxu0 %v698_v58 }
 0x234   :  { %1265 = vmatpush3.msra.mxu1 %v692_v56  ;;  %1272 = vmatpush3.msra.mxu0 %v698_v58 }
 0x235   :  { %1267 = vmatmul.mubr.msk.f32.vlgmr.msra.gmra.mxu1 %vm408_vm1, %v1487_v11  ;;  %1273 = vmatprep.subr.mxu0 %v697_v57 }
 0x236   :  { %1280 = vmatprep.subr.mxu1 %v432_v43  ;;  %1274 = vmatpush3.msra.mxu0 %v697_v57 }
 0x237   :  { %1281 = vmatpush3.msra.mxu1 %v432_v43  ;;  %1288 = vmatprep.mubr.msk.f32.mxu1 %vm408_vm1, %v862_v60 }
 0x238   :  { %1275 = vmatprep.subr.mxu0 %v696_v59  ;;  %1282 = vmatprep.subr.mxu1 %v431_v45 }
 0x239   :  { %1276 = vmatpush3.msra.mxu0 %v696_v59  ;;  %1283 = vmatpush3.msra.mxu1 %v431_v45 }
 0x23a   :  { %1278 = vmatmul.mubr.msk.f32.vlgmr.msra.gmra.mxu0 %vm408_vm1, %v1495_v21  ;;  %1284 = vmatprep.subr.mxu1 %v430_v48 }
 0x23b   :  { %1285 = vmatpush3.msra.mxu1 %v430_v48  ;;  %1294 = vmatprep.subr.mxu0 %v986_v62 }
 0x23c   :  { %1286 = vmatprep.subr.mxu1 %v429_v51  ;;  %1295 = vmatpush3.msra.mxu0 %v986_v62 }
 0x23d   :  { %1287 = vmatpush3.msra.mxu1 %v429_v51  ;;  %1296 = vmatprep.subr.mxu0 %v985_v63 }
 0x23e   :  { %1289 = vmatmul.mubr.msk.f32.vlgmr.msra.gmra.mxu1 %vm408_vm1, %v1493_v19  ;;  %1297 = vmatpush3.msra.mxu0 %v985_v63 }
 0x23f   :  { %1291 = vmatprep.mubr.msk.f32.mxu1 %vm408_vm1, %v864_v61  ;;  %1298 = vmatprep.subr.mxu0 %v984_v0 }
 0x240   :  { %1299 = vmatpush3.msra.mxu0 %v984_v0 }
 0x241   :  { %1300 = vmatprep.subr.mxu0 %v983_v1 }
 0x242   :  { %1292 = vmatmul.mubr.msk.f32.gmra.mxu1 %vm408_vm1, %v1501_v23  ;;  %1301 = vmatpush3.msra.mxu0 %v983_v1 }
 0x2f5   :  { %v1268_v7 = vpop.f32.mrf.mxu1 }
 0x2f7   :  { %v772_v8 = vpop.f32.mrf.mxu1 }
 0x2fa   :  { %v1279_v29 = vpop.f32.mrf.mxu0 }
 0x2fc   :  { %v853_v34 = vpop.f32.mrf.mxu0 }
 0x2fe   :  { %v1290_v9 = vpop.f32.mrf.mxu1 }
 0x2ff   :  { %1330 = vrcp.f32 %v1290_v9 }
 0x300   :  { %v944_v10 = vpop.f32.mrf.mxu1 }
 0x301   :  { %1332 = vrcp.f32 %v944_v10 }
 0x302   :  { %v1293_v11 = vpop.f32.mrf.mxu1 }
 0x303   :  { %1334 = vrcp.f32 %v1293_v11 }
 0x304   :  { %v954_v12 = vpop.f32.mrf.mxu1 }
 0x305   :  { %1336 = vrcp.f32 %v954_v12 }
 0x30c   :  { %v1331_v13 = vpop.eup %1330 }
 0x30d   :  { %v968_v14 = vmul.f32 %v1331_v13, %v1290_v9 }
 0x30e   :  { %v1333_v16 = vpop.eup %1332 }
 0x30f   :  { %v972_v17 = vsub.f32 2.0, %v968_v14  ;;  %v967_v19 = vmul.f32 %v1333_v16, %v944_v10 }
 0x310   :  { %v1335_v20 = vpop.eup %1334 }
 0x311   :  { %v971_v21 = vsub.f32 2.0, %v967_v19  ;;  %v970_v22 = vmul.f32 %v1335_v20, %v1293_v11  ;;  %v976_v25 = vmul.f32 %v1331_v13, %v972_v17 }
 0x312   :  { %v1337_v23 = vpop.eup %1336 }
 0x313   :  { %v975_v26 = vmul.f32 %v1333_v16, %v971_v21  ;;  %v974_v27 = vsub.f32 2.0, %v970_v22  ;;  %v969_v28 = vmul.f32 %v1337_v23, %v954_v12  ;;  %v980_v32 = vmul.f32 %v1268_v7, %v976_v25 }
 0x315   :  { %v979_v30 = vmul.f32 %v975_v26, %v772_v8  ;;  %v973_v31 = vsub.f32 2.0, %v969_v28  ;;  %v978_v33 = vmul.f32 %v1335_v20, %v974_v27 }
 0x317   :  { %v977_v24 = vmul.f32 %v1337_v23, %v973_v31  ;;  %1302 = vmatprep.mubr.msk.f32.mxu0 %vm408_vm1, %v979_v30  ;;  %v982_v15 = vmul.f32 %v1279_v29, %v978_v33 }
 0x318   :  { %1303 = vmatmul.mubr.msk.f32.vlgmr.msra.gmra.mxu0 %vm408_vm1, %v980_v32 }
 0x319   :  { %v981_v35 = vmul.f32 %v977_v24, %v853_v34 }
 0x31b   :  { %1305 = vmatprep.mubr.msk.f32.mxu0 %vm408_vm1, %v981_v35 }
 0x31c   :  { %1306 = vmatmul.mubr.msk.f32.gmra.mxu0 %vm408_vm1, %v982_v15 }
 0x3d8   :  { %v1304_v38 = vpop.f32.mrf.mxu0 }
 0x3d9   :  { %v1078_v39 = vadd.f32 %v1304_v38, %v1154_v36 }
 0x3da   :  { %v1072_v40 = vpop.f32.mrf.mxu0 }
 0x3db   :  { %v1112_v42 = vmul.f32 %v1099_v18, %v1078_v39  ;;  %v1073_v43 = vadd.f32 %v1154_v36, %v1072_v40 }
 0x3dc   :  { %v1307_v44 = vpop.f32.mrf.mxu0 }
 0x3dd   :  { %1116 = vst.msk [vmem:[%s1601_s13 + $0x8] sm:$0xff] %vm68_vm0, %v1112_v42  ;;  %v1111_v45 = vmul.f32 %v1094_v41, %v1073_v43  ;;  %v1088_v46 = vadd.f32 %v1307_v44, %v1154_v36 }
 0x3de   :  { %v1082_v48 = vpop.f32.mrf.mxu0 }
 0x3df   :  { %1115 = vst.msk [vmem:[%s1601_s13] sm:$0xff] %vm68_vm0, %v1111_v45  ;;  %v1114_v49 = vmul.f32 %v1109_v47, %v1088_v46  ;;  %v1083_v50 = vadd.f32 %v1154_v36, %v1082_v48 }
 0x3e1   :  { %1118 = vst.msk [vmem:[%s1601_s13 + $0x18] sm:$0xff] %vm68_vm0, %v1114_v49  ;;  %v1113_v51 = vmul.f32 %v1104_v37, %v1083_v50 }
 0x3e3   :  { %1117 = vst.msk [vmem:[%s1601_s13 + $0x10] sm:$0xff] %vm68_vm0, %v1113_v51 }

</bundles_post_ra>
